<compile_context>
chip_gen: v7x
topology: tpu7x:2x2x1
jax: 0.10.0
libtpu: 0.0.40
codegen_flags: <defaults>
</compile_context>

<pallas_src>
import functools

import jax
import jax.numpy as jnp
from jax.experimental import pallas as pl
from jax.experimental.pallas import tpu as pltpu


LANE = 128        # vreg lane width  (feature-dim padding target)
SUBLANE = 8       # f32 sublane width (batch-tile granularity)
_MAX_TK = 4096    # hard cap on the layer-0 K tile
_W0_TILE_BYTES = 4 * 1024 * 1024   # target size of one (tk, h1_pad) weight tile


def _round_up(x, m):
    return ((x + m - 1) // m) * m


def _choose_tk(k_128, h1_pad, w_itemsize, max_tk=None):
    """Largest K tile (multiple of 128) whose layer-0 weight tile stays small."""
    tk = (_W0_TILE_BYTES // max(h1_pad * w_itemsize, 1)) // LANE * LANE
    tk = max(LANE, min(tk, _MAX_TK, k_128))
    if max_tk is not None:
        tk = max(LANE, min(tk, _round_up(max_tk, LANE)))
    return tk


def _vmem_limit_bytes(footprint_bytes):
    """Clamp the requested VMEM to ~75% of physical capacity per generation."""
    cap = 128 * 1024 * 1024
    try:
        info = pltpu.get_tpu_info()
        cap = int(getattr(info, "vmem_capacity_bytes", cap))
    except Exception:
        pass
    safe_cap = (cap * 3) // 4                  # ~48 MiB on v7x, ~96 MiB on v5e/v6e
    want = int(footprint_bytes) + (8 << 20)    # headroom for compiler scratch
    return int(max(min(want, safe_cap), 16 << 20))


def _spec(shape, index_map, buffers=None):
    """BlockSpec with an optional multi-buffering hint (fallback if the
    installed jax doesn't accept pipeline_mode)."""
    if buffers is not None and hasattr(pl, "Buffered"):
        try:
            return pl.BlockSpec(shape, index_map, pipeline_mode=pl.Buffered(buffers))
        except TypeError:
            pass
    return pl.BlockSpec(shape, index_map)


# ----------------------------------------------------------------------------
# Fused kernel: K-tiled first Linear + remaining small Linear/ReLU layers
# ----------------------------------------------------------------------------
def _bow_kernel(x_ref, w0_ref, b0_ref, *rest, num_layers):
    """rest = (w_1, b_1, ..., w_{L-1}, b_{L-1}, o_ref, acc_ref).

    Grid = (batch_tiles, k_tiles); k is the reduction axis of layer 0.
    acc_ref is a (tm, h1_pad) f32 VMEM accumulator.
    """
    o_ref = rest[-2]
    acc_ref = rest[-1]
    k = pl.program_id(1)

    @pl.when(k == 0)
    def _():
        acc_ref[...] = jnp.zeros_like(acc_ref)

    w0 = w0_ref[...]
    acc_ref[...] += jnp.dot(x_ref[...].astype(w0.dtype), w0,
                            preferred_element_type=jnp.float32)

    @pl.when(k == pl.num_programs(1) - 1)
    def _():
        h = acc_ref[...] + b0_ref[...].astype(jnp.float32)
        for l in range(1, num_layers):
            h = jnp.maximum(h, 0.0)                       # ReLU between layers
            w = rest[2 * (l - 1)][...]
            b = rest[2 * (l - 1) + 1][...]
            h = (jnp.dot(h.astype(w.dtype), w, preferred_element_type=jnp.float32)
                 + b.astype(jnp.float32))
        o_ref[...] = h.astype(o_ref.dtype)                # no activation on last


@functools.partial(jax.jit, static_argnames=("out_dim", "tk"))
def bow_forward(padded_params, x, out_dim, tk):
    """padded_params: list of (w_pad (in_pad, out_pad), b_pad (1, out_pad)),
    produced by pad_params (bf16, lane-dense, layer-0 K padded to tk).
    x: (B, in_dim).  Returns (B, out_dim) in x.dtype (f32 accumulation)."""
    B, in_dim = x.shape
    num_layers = len(padded_params)
    w0, b0 = padded_params[0]
    k_pad, h1_pad = w0.shape
    out_pad = padded_params[-1][0].shape[1]
    assert k_pad % tk == 0 and in_dim <= k_pad

    x_itemsize = jnp.dtype(x.dtype).itemsize
    w_itemsize = jnp.dtype(w0.dtype).itemsize
    sublane = max(SUBLANE, 32 // x_itemsize)    # f32: 8, bf16: 16, int8: 32

    # Batch tiling: bigger tiles amortize the ~0.35us/step overhead; keep
    # >=2 tiles for large batches so "parallel" can split across TCs.
    if B >= 512:
        tm = 256
    elif B >= 128:
        tm = 128
    else:
        tm = _round_up(B, sublane)
    b_pad = _round_up(B, tm)
    num_k = k_pad // tk

    # Skip the padding copy when the caller's x is already aligned.
    if (B, in_dim) != (b_pad, k_pad):
        x_in = jnp.zeros((b_pad, k_pad), x.dtype).at[:B, :in_dim].set(x)
    else:
        x_in = x

    # Deeper pipelining on the K-streamed operands when the K loop is long.
    xw_buffers = 3 if num_k >= 3 else None
    in_specs = [
        _spec((tm, tk), lambda i, k: (i, k), buffers=xw_buffers),       # x tile
        _spec((tk, h1_pad), lambda i, k: (k, 0), buffers=xw_buffers),   # w0 tile
        _spec(b0.shape, lambda i, k: (0, 0), buffers=1),                # resident b0
    ]
    flat_params = [w0, b0]
    for w, b in padded_params[1:]:
        # Grid-invariant: DMA once, single-buffered, VMEM-resident.
        in_specs.append(_spec(w.shape, lambda i, k: (0, 0), buffers=1))
        in_specs.append(_spec(b.shape, lambda i, k: (0, 0), buffers=1))
        flat_params += [w, b]

    # VMEM footprint -> per-generation vmem_limit_bytes.
    nbuf = xw_buffers if xw_buffers is not None else 2
    footprint = nbuf * tm * tk * x_itemsize            # x tiles
    footprint += nbuf * tk * h1_pad * w_itemsize       # w0 tiles
    footprint += 2 * tm * out_pad * x_itemsize         # out tiles
    footprint += tm * h1_pad * 4                       # f32 accumulator scratch
    footprint += b0.size * w_itemsize                  # resident b0
    for w, b in padded_params[1:]:
        footprint += (w.size + b.size) * jnp.dtype(w.dtype).itemsize

    # Cost estimate so XLA can schedule surrounding ops around the call.
    flops = 0
    bytes_accessed = (b_pad * k_pad + b_pad * out_pad) * x_itemsize
    for w, b in padded_params:
        flops += 2 * b_pad * int(w.shape[0]) * int(w.shape[1])
        bytes_accessed += (w.size + b.size) * jnp.dtype(w.dtype).itemsize
    cost = pl.CostEstimate(flops=int(flops), transcendentals=0,
                           bytes_accessed=int(bytes_accessed))

    out = pl.pallas_call(
        functools.partial(_bow_kernel, num_layers=num_layers),
        out_shape=jax.ShapeDtypeStruct((b_pad, out_pad), x.dtype),
        grid=(b_pad // tm, num_k),
        in_specs=in_specs,
        out_specs=pl.BlockSpec((tm, out_pad), lambda i, k: (i, 0)),
        scratch_shapes=[pltpu.VMEM((tm, h1_pad), jnp.float32)],
        compiler_params=pltpu.CompilerParams(
            dimension_semantics=("parallel", "arbitrary"),
            vmem_limit_bytes=_vmem_limit_bytes(footprint),
        ),
        cost_estimate=cost,
    )(x_in, *flat_params)

    # Slice the padded lane-dense slab back to the logical output (skipped
    # when already aligned).  Padded rows/cols carry bias/ReLU garbage and
    # must never be reduced over without this slice.
    if (B, out_dim) == (b_pad, out_pad):
        return out
    return out[:B, :out_dim]


# ----------------------------------------------------------------------------
# BOWModel: parameter construction (deterministic) + padding helpers
# ----------------------------------------------------------------------------
def init_bow_params(key, in_dim, out_dim=1, hidden_dims=()):
    """Mimics nn.Linear default init: U(-k, k) with k = 1/sqrt(fan_in)."""
    dims = [in_dim] + list(hidden_dims) + [out_dim]
    params = []
    for i in range(len(dims) - 1):
        key, kw, kb = jax.random.split(key, 3)
        fan_in, fan_out = dims[i], dims[i + 1]
        bound = 1.0 / jnp.sqrt(jnp.float32(fan_in))
        w = jax.random.uniform(kw, (fan_in, fan_out), jnp.float32,
                               minval=-bound, maxval=bound)
        b = jax.random.uniform(kb, (1, fan_out), jnp.float32,
                               minval=-bound, maxval=bound)
        params.append((w, b))
    return params


def pad_params(params, param_dtype=jnp.bfloat16, max_tk=None):
    """Zero-pad every weight/bias to 128-multiples (lane-dense tiles), cast
    to param_dtype (bf16 by default; matmuls still accumulate in f32), and
    pad layer-0's K dim to a multiple of the chosen K tile.
    Returns (padded_params, tk).  Done once at setup, not per forward."""
    padded = []
    tk = LANE
    for idx, (w, b) in enumerate(params):
        fi, fo = w.shape
        fi_p, fo_p = _round_up(fi, LANE), _round_up(fo, LANE)
        if idx == 0:
            tk = _choose_tk(fi_p, fo_p, jnp.dtype(param_dtype).itemsize, max_tk)
            fi_p = _round_up(fi_p, tk)
        w_p = jnp.zeros((fi_p, fo_p), param_dtype).at[:fi, :fo].set(
            w.astype(param_dtype))
        b_p = jnp.zeros((1, fo_p), param_dtype).at[:, :fo].set(
            b.reshape(1, -1).astype(param_dtype))
        padded.append((w_p, b_p))
    return padded, tk


# ----------------------------------------------------------------------------
# References
# ----------------------------------------------------------------------------
def bow_forward_ref(params, x):
    """Pure-f32 reference matching the PyTorch module semantics."""
    n = len(params)
    h = x
    for i, (w, b) in enumerate(params):
        h = h @ w + b.reshape(1, -1)
        if i != n - 1:
            h = jnp.maximum(h, 0.0)
    return h


def bow_forward_ref_padded(padded_params, x, out_dim):
    """Mirrors the kernel arithmetic exactly (bf16 operands, f32 accumulation)."""
    k_pad = padded_params[0][0].shape[0]
    h = x.astype(jnp.float32)
    if h.shape[1] != k_pad:
        h = jnp.pad(h, ((0, 0), (0, k_pad - h.shape[1])))
    n = len(padded_params)
    for i, (w, b) in enumerate(padded_params):
        h = (jnp.dot(h.astype(w.dtype), w, preferred_element_type=jnp.float32)
             + b.astype(jnp.float32))
        if i != n - 1:
            h = jnp.maximum(h, 0.0)
    return h[:, :out_dim].astype(x.dtype)


if __name__ == "__main__":
    key = jax.random.PRNGKey(0)

    # --- Test 1: toy BOWModel(in_dim=32, out_dim=1, hidden_dims=[64, 32]) ---
    batch, in_dim, hidden_dims, out_dim = 8, 32, [64, 32], 1
    key, kx, kp = jax.random.split(key, 3)
    x = jax.random.normal(kx, (batch, in_dim), jnp.float32)
    params = init_bow_params(kp, in_dim, out_dim, hidden_dims)
    padded, tk = pad_params(params)

    y = jax.block_until_ready(bow_forward(padded, x, out_dim=out_dim, tk=tk))
    assert y.shape == (batch, out_dim) and y.dtype == x.dtype
    y_mirror = bow_forward_ref_padded(padded, x, out_dim)
    assert jnp.allclose(y, y_mirror, atol=1e-3, rtol=1e-3)
    y_f32 = bow_forward_ref(params, x)
    assert jnp.allclose(y, y_f32, atol=5e-2, rtol=5e-2)  # bf16 weights vs f32 ref

    # --- Test 2: exercise the K-tiled + multi-batch-tile path ---
    batch2, in_dim2, hidden2, out_dim2 = 256, 512, [64], 4
    key, kx2, kp2 = jax.random.split(key, 3)
    x2 = jax.random.normal(kx2, (batch2, in_dim2), jnp.float32)
    params2 = init_bow_params(kp2, in_dim2, out_dim2, hidden2)
    padded2, tk2 = pad_params(params2, max_tk=128)       # force 4 K tiles
    y2 = jax.block_until_ready(bow_forward(padded2, x2, out_dim=out_dim2, tk=tk2))
    assert y2.shape == (batch2, out_dim2)
    y2_mirror = bow_forward_ref_padded(padded2, x2, out_dim2)
    assert jnp.allclose(y2, y2_mirror, atol=1e-3, rtol=1e-3)

    print("KERNEL_OK")
</pallas_src>

<mosaic_0001>
module attributes {stable_mosaic.version = 11 : i64} {
  func.func @_bow_kernel(%arg0: i32, %arg1: i32, %arg2: memref<8x128xf32, #tpu.memory_space<vmem>>, %arg3: memref<128x128xbf16, #tpu.memory_space<vmem>>, %arg4: memref<1x128xbf16, #tpu.memory_space<vmem>>, %arg5: memref<128x128xbf16, #tpu.memory_space<vmem>>, %arg6: memref<1x128xbf16, #tpu.memory_space<vmem>>, %arg7: memref<128x128xbf16, #tpu.memory_space<vmem>>, %arg8: memref<1x128xbf16, #tpu.memory_space<vmem>>, %arg9: memref<8x128xf32, #tpu.memory_space<vmem>>, %arg10: memref<8x128xf32, #tpu.memory_space<vmem>>) attributes {dimension_semantics = [#tpu.dimension_semantics<parallel>, #tpu.dimension_semantics<arbitrary>], iteration_bounds = array<i64: 1, 1>, scalar_prefetch = 0 : i64, scratch_operands = 1 : i64, tpu.core_type = #tpu.core_type<tc>, window_params = [{transform_indices = @transform_0, window_bounds = array<i64: 8, 128>}, {transform_indices = @transform_1, window_bounds = array<i64: 128, 128>}, {pipeline_mode = #tpu.pipeline_mode<synchronous>, transform_indices = @transform_2, window_bounds = array<i64: 1, 128>}, {pipeline_mode = #tpu.pipeline_mode<synchronous>, transform_indices = @transform_3, window_bounds = array<i64: 128, 128>}, {pipeline_mode = #tpu.pipeline_mode<synchronous>, transform_indices = @transform_4, window_bounds = array<i64: 1, 128>}, {pipeline_mode = #tpu.pipeline_mode<synchronous>, transform_indices = @transform_5, window_bounds = array<i64: 128, 128>}, {pipeline_mode = #tpu.pipeline_mode<synchronous>, transform_indices = @transform_6, window_bounds = array<i64: 1, 128>}, {transform_indices = @transform_7, window_bounds = array<i64: 8, 128>}]} {
    %c0_i32 = arith.constant 0 : i32
    %0 = arith.cmpi eq, %arg1, %c0_i32 : i32
    %1 = arith.extui %0 : i1 to i32
    %c0_i32_0 = arith.constant 0 : i32
    %2 = arith.cmpi ne, %1, %c0_i32_0 : i32
    scf.if %2 {
      %cst_10 = arith.constant 0.000000e+00 : f32
      %13 = vector.broadcast %cst_10 : f32 to vector<8x128xf32>
      %c0_11 = arith.constant 0 : index
      %c0_12 = arith.constant 0 : index
      %14 = vector.load %arg10[%c0_11, %c0_12] : memref<8x128xf32, #tpu.memory_space<vmem>>, vector<8x128xf32>
      tpu.vector_store %arg10[%c0_11, %c0_12], %13 {strides = array<i32>} : memref<8x128xf32, #tpu.memory_space<vmem>>, vector<8x128xf32>,
    } else {
    }
    %c0 = arith.constant 0 : index
    %c0_1 = arith.constant 0 : index
    %3 = vector.load %arg3[%c0, %c0_1] : memref<128x128xbf16, #tpu.memory_space<vmem>>, vector<128x128xbf16>
    %c0_2 = arith.constant 0 : index
    %c0_3 = arith.constant 0 : index
    %4 = vector.load %arg10[%c0_2, %c0_3] : memref<8x128xf32, #tpu.memory_space<vmem>>, vector<8x128xf32>
    %c0_4 = arith.constant 0 : index
    %c0_5 = arith.constant 0 : index
    %5 = vector.load %arg2[%c0_4, %c0_5] : memref<8x128xf32, #tpu.memory_space<vmem>>, vector<8x128xf32>
    %6 = arith.truncf %5 : vector<8x128xf32> to vector<8x128xbf16>
    %cst = arith.constant dense<0.000000e+00> : vector<8x128xf32>
    %7 = tpu.matmul %6, %3, %cst {dimension_numbers = #tpu.dot_dimension_numbers<[1], [0], [0], [1], [0, 0, 1, 1], [], []>} : vector<8x128xbf16>, vector<128x128xbf16>, vector<8x128xf32> -> vector<8x128xf32>
    %8 = arith.addf %4, %7 : vector<8x128xf32>
    %c0_6 = arith.constant 0 : index
    %c0_7 = arith.constant 0 : index
    %9 = vector.load %arg10[%c0_6, %c0_7] : memref<8x128xf32, #tpu.memory_space<vmem>>, vector<8x128xf32>
    tpu.vector_store %arg10[%c0_6, %c0_7], %8 {strides = array<i32>} : memref<8x128xf32, #tpu.memory_space<vmem>>, vector<8x128xf32>,
    %c0_i32_8 = arith.constant 0 : i32
    %10 = arith.cmpi eq, %arg1, %c0_i32_8 : i32
    %11 = arith.extui %10 : i1 to i32
    %c0_i32_9 = arith.constant 0 : i32
    %12 = arith.cmpi ne, %11, %c0_i32_9 : i32
    scf.if %12 {
      %c0_10 = arith.constant 0 : index
      %c0_11 = arith.constant 0 : index
      %13 = vector.load %arg10[%c0_10, %c0_11] : memref<8x128xf32, #tpu.memory_space<vmem>>, vector<8x128xf32>
      %c0_12 = arith.constant 0 : index
      %c0_13 = arith.constant 0 : index
      %14 = vector.load %arg4[%c0_12, %c0_13] : memref<1x128xbf16, #tpu.memory_space<vmem>>, vector<1x128xbf16>
      %15 = arith.extf %14 : vector<1x128xbf16> to vector<1x128xf32>
      %16 = vector.broadcast %15 : vector<1x128xf32> to vector<8x128xf32>
      %17 = arith.addf %13, %16 : vector<8x128xf32>
      %cst_14 = arith.constant 0.000000e+00 : f32
      %18 = vector.broadcast %cst_14 : f32 to vector<8x128xf32>
      %19 = arith.maximumf %17, %18 : vector<8x128xf32>
      %c0_15 = arith.constant 0 : index
      %c0_16 = arith.constant 0 : index
      %20 = vector.load %arg5[%c0_15, %c0_16] : memref<128x128xbf16, #tpu.memory_space<vmem>>, vector<128x128xbf16>
      %c0_17 = arith.constant 0 : index
      %c0_18 = arith.constant 0 : index
      %21 = vector.load %arg6[%c0_17, %c0_18] : memref<1x128xbf16, #tpu.memory_space<vmem>>, vector<1x128xbf16>
      %22 = arith.truncf %19 : vector<8x128xf32> to vector<8x128xbf16>
      %cst_19 = arith.constant dense<0.000000e+00> : vector<8x128xf32>
      %23 = tpu.matmul %22, %20, %cst_19 {dimension_numbers = #tpu.dot_dimension_numbers<[1], [0], [0], [1], [0, 0, 1, 1], [], []>} : vector<8x128xbf16>, vector<128x128xbf16>, vector<8x128xf32> -> vector<8x128xf32>
      %24 = arith.extf %21 : vector<1x128xbf16> to vector<1x128xf32>
      %25 = vector.broadcast %24 : vector<1x128xf32> to vector<8x128xf32>
      %26 = arith.addf %23, %25 : vector<8x128xf32>
      %cst_20 = arith.constant 0.000000e+00 : f32
      %27 = vector.broadcast %cst_20 : f32 to vector<8x128xf32>
      %28 = arith.maximumf %26, %27 : vector<8x128xf32>
      %c0_21 = arith.constant 0 : index
      %c0_22 = arith.constant 0 : index
      %29 = vector.load %arg7[%c0_21, %c0_22] : memref<128x128xbf16, #tpu.memory_space<vmem>>, vector<128x128xbf16>
      %c0_23 = arith.constant 0 : index
      %c0_24 = arith.constant 0 : index
      %30 = vector.load %arg8[%c0_23, %c0_24] : memref<1x128xbf16, #tpu.memory_space<vmem>>, vector<1x128xbf16>
      %31 = arith.truncf %28 : vector<8x128xf32> to vector<8x128xbf16>
      %cst_25 = arith.constant dense<0.000000e+00> : vector<8x128xf32>
      %32 = tpu.matmul %31, %29, %cst_25 {dimension_numbers = #tpu.dot_dimension_numbers<[1], [0], [0], [1], [0, 0, 1, 1], [], []>} : vector<8x128xbf16>, vector<128x128xbf16>, vector<8x128xf32> -> vector<8x128xf32>
      %33 = arith.extf %30 : vector<1x128xbf16> to vector<1x128xf32>
      %34 = vector.broadcast %33 : vector<1x128xf32> to vector<8x128xf32>
      %35 = arith.addf %32, %34 : vector<8x128xf32>
      %c0_26 = arith.constant 0 : index
      %c0_27 = arith.constant 0 : index
      %36 = vector.load %arg9[%c0_26, %c0_27] : memref<8x128xf32, #tpu.memory_space<vmem>>, vector<8x128xf32>
      tpu.vector_store %arg9[%c0_26, %c0_27], %35 {strides = array<i32>} : memref<8x128xf32, #tpu.memory_space<vmem>>, vector<8x128xf32>,
    } else {
    }
    return
  }
  func.func @transform_0(%arg0: i32, %arg1: i32) -> (i32, i32) {
    %c0_i32 = arith.constant 0 : i32
    return %arg0, %arg1 : i32, i32
  }
  func.func @transform_1(%arg0: i32, %arg1: i32) -> (i32, i32) {
    %c0_i32 = arith.constant 0 : i32
    %c0_i32_0 = arith.constant 0 : i32
    return %arg1, %c0_i32 : i32, i32
  }
  func.func @transform_2(%arg0: i32, %arg1: i32) -> (i32, i32) {
    %c0_i32 = arith.constant 0 : i32
    %c0_i32_0 = arith.constant 0 : i32
    %c0_i32_1 = arith.constant 0 : i32
    return %c0_i32, %c0_i32_0 : i32, i32
  }
  func.func @transform_3(%arg0: i32, %arg1: i32) -> (i32, i32) {
    %c0_i32 = arith.constant 0 : i32
    %c0_i32_0 = arith.constant 0 : i32
    %c0_i32_1 = arith.constant 0 : i32
    return %c0_i32, %c0_i32_0 : i32, i32
  }
  func.func @transform_4(%arg0: i32, %arg1: i32) -> (i32, i32) {
    %c0_i32 = arith.constant 0 : i32
    %c0_i32_0 = arith.constant 0 : i32
    %c0_i32_1 = arith.constant 0 : i32
    return %c0_i32, %c0_i32_0 : i32, i32
  }
  func.func @transform_5(%arg0: i32, %arg1: i32) -> (i32, i32) {
    %c0_i32 = arith.constant 0 : i32
    %c0_i32_0 = arith.constant 0 : i32
    %c0_i32_1 = arith.constant 0 : i32
    return %c0_i32, %c0_i32_0 : i32, i32
  }
  func.func @transform_6(%arg0: i32, %arg1: i32) -> (i32, i32) {
    %c0_i32 = arith.constant 0 : i32
    %c0_i32_0 = arith.constant 0 : i32
    %c0_i32_1 = arith.constant 0 : i32
    return %c0_i32, %c0_i32_0 : i32, i32
  }
  func.func @transform_7(%arg0: i32, %arg1: i32) -> (i32, i32) {
    %c0_i32 = arith.constant 0 : i32
    %c0_i32_0 = arith.constant 0 : i32
    return %arg0, %c0_i32 : i32, i32
  }
}

</mosaic_0001>

<bundles_post_ra>
// kernel: bow_forward.1
= control target key start
LH: loop header
LB: loop body
LE: loop exit
PB: predicated region body
PF: predicated region fallthrough
CT: control target
= control target key end

     0   :  { %12 = vsyncpa [#allocation4], 0  ;;  %s780_s0 = inlined_call_operand.vmem [shape: f32[8,128], index: 0, kind: input, shape index: {}]   ;;  %s781_s1 = inlined_call_operand.hbm [shape: bf16[128,128], index: 1, kind: input, shape index: {}]   ;;  %s782_s2 = inlined_call_operand.vmem [shape: bf16[1,128], index: 2, kind: input, shape index: {}]   ;;  %s783_s3 = inlined_call_operand.hbm [shape: bf16[128,128], index: 3, kind: input, shape index: {}]   ;;  %s784_s4 = inlined_call_operand.vmem [shape: bf16[1,128], index: 4, kind: input, shape index: {}]   ;;  %s785_s5 = inlined_call_operand.hbm [shape: bf16[128,128], index: 5, kind: input, shape index: {}]   ;;  %s786_s6 = inlined_call_operand.vmem [shape: bf16[1,128], index: 6, kind: input, shape index: {}]   ;;  %s787_s7 = inlined_call_operand.vmem [shape: f32[8,128], index: 7, kind: output, shape index: {}]  }
   0x1   :  { %13 = vsyncpa [#allocation6], 0  ;;  %s636_s24 = smov [#allocation5]   ;;  %s637_s26 = smov [#allocation3]  }
   0x2   :  { %s35_s25 = sshll.u32 %s636_s24, 4  ;;  %s21_s27 = sshll.u32 %s637_s26, 4  ;;  %s36_s25 = int_to_ptr.vmem [resolvable:$true] %s35_s25  ;;  %s683_s27 = int_to_ptr.vmem [resolvable:$true] %s21_s27 }
   0x3   :  { %s566_s30 = scalar_lea.hbm %s783_s3, 1024 }
   0x4   :  { %p567_p0 = scmp.ne.s32.totalorder %s783_s3, %s566_s30  ;;  %p570_p1 = scmp.lt.u32.totalorder %s566_s30, %s783_s3 }
   0x6   :  { %p572_p2 = pnand %p570_p1, %p567_p0 }
   0x8   :  { %575 = shalt.err (!%p572_p2)
}
   0x9   :  { %s576_s12 = scalar_lea.vmem %s36_s25, 1024  ;;  %p581_p4 = scmp.lt.s32.totalorder %s36_s25, %s36_s25 }
   0xa   :  { %p577_p3 = scmp.ne.s32.totalorder %s36_s25, %s576_s12  ;;  %p582_p5 = scmp.lt.s32.totalorder %s576_s12, %s576_s12 }
   0xc   :  { %p583_p6 = por %p582_p5, %p581_p4 }
   0xe   :  { %p584_p7 = pnand %p583_p6, %p577_p3 }
  0x10   :  { %587 = shalt.err (!%p584_p7)
}
  0x11   :  { %s638_s13 = smov 64   ;;  %s639_s14 = smov 4  }
  0x12   :  { %41 = dma.hbm_to_vmem [thread:$0]  %s783_s3, 1024, %s36_s25, [#allocation6], %s638_s13, %s638_s13, %s639_s14  }
  0x13   :  { %s588_s19 = scalar_lea.hbm %s781_s1, 1024 }
  0x14   :  { %p589_p8 = scmp.ne.s32.totalorder %s781_s1, %s588_s19  ;;  %p592_p9 = scmp.lt.u32.totalorder %s588_s19, %s781_s1 }
  0x16   :  { %p594_p10 = pnand %p592_p9, %p589_p8 }
  0x18   :  { %597 = shalt.err (!%p594_p10)
}
  0x19   :  { %s598_s24 = scalar_lea.vmem %s683_s27, 1024  ;;  %p603_p12 = scmp.lt.s32.totalorder %s683_s27, %s683_s27 }
  0x1a   :  { %p599_p11 = scmp.ne.s32.totalorder %s683_s27, %s598_s24  ;;  %p604_p13 = scmp.lt.s32.totalorder %s598_s24, %s598_s24 }
  0x1c   :  { %p605_p0 = por %p604_p13, %p603_p12 }
  0x1e   :  { %p606_p1 = pnand %p605_p0, %p599_p11 }
  0x20   :  { %609 = shalt.err (!%p606_p1)
}
  0x21   :  { %27 = dma.hbm_to_vmem [thread:$0]  %s781_s1, 1024, %s683_s27, [#allocation4], %s638_s13, %s638_s13, %s639_s14  }
  0x22   :  { %s640_s26 = smov [#allocation7]   ;;  %s610_s8 = scalar_lea.hbm %s785_s5, 1024 }
  0x23   :  { %s49_s28 = sshll.u32 %s640_s26, 4  ;;  %p611_p2 = scmp.ne.s32.totalorder %s785_s5, %s610_s8  ;;  %s50_s28 = int_to_ptr.vmem [resolvable:$true] %s49_s28 }
  0x24   :  { %p614_p3 = scmp.lt.u32.totalorder %s610_s8, %s785_s5 }
  0x26   :  { %p616_p4 = pnand %p614_p3, %p611_p2 }
  0x28   :  { %619 = shalt.err (!%p616_p4)
}
  0x29   :  { %s620_s15 = scalar_lea.vmem %s50_s28, 1024  ;;  %p625_p6 = scmp.lt.s32.totalorder %s50_s28, %s50_s28 }
  0x2a   :  { %p621_p5 = scmp.ne.s32.totalorder %s50_s28, %s620_s15  ;;  %p626_p7 = scmp.lt.s32.totalorder %s620_s15, %s620_s15 }
  0x2c   :  { %p627_p8 = por %p626_p7, %p625_p6 }
  0x2e   :  { %p628_p9 = pnand %p627_p8, %p621_p5 }
  0x30   :  { %631 = shalt.err (!%p628_p9)
}
  0x31   :  { %55 = dma.hbm_to_vmem [thread:$0]  %s785_s5, 1024, %s50_s28, [#allocation6], %s638_s13, %s638_s13, %s639_s14  }
  0x32   :  { %632 = dma.done.wait [#allocation4], 1024  }
  0x33   :  { %633 = vsyncadd [#allocation4], 4294966272 }
  0x34   :  { %634 = dma.done.wait [#allocation6], 2048  }
  0x35   :  { %635 = vsyncadd [#allocation6], 4294965248  ;;  %v641_v0 = vmov 0.0   ;;  %vm642_vm0 = vmmov 0   ;;  %v542_v1 = vld [vmem:[#allocation3] sm:$0xff]   ;;  %v543_v2 = vld [vmem:[#allocation3 + $0x8] sm:$0xff]   ;;  %v188_v25 = vlaneseq }
  0x36   :  { %475 = vmatprep.subr.bf16.mxu0 %v641_v0  ;;  %491 = vmatprep.mubr.msk.bf16.mxu0 %vm642_vm0, %v641_v0  ;;  %v544_v3 = vld [vmem:[#allocation3 + $0x10] sm:$0xff]   ;;  %v550_v4 = vld [vmem:[#allocation5] sm:$0xff]   ;;  %v545_v5 = vld [vmem:[#allocation3 + $0x18] sm:$0xff]  }
  0x37   :  { %495 = vmatprep.subr.bf16.mxu1 %v641_v0  ;;  %511 = vmatprep.mubr.msk.bf16.mxu1 %vm642_vm0, %v641_v0  ;;  %v551_v6 = vld [vmem:[#allocation5 + $0x8] sm:$0xff]   ;;  %v546_v7 = vld [vmem:[#allocation3 + $0x20] sm:$0xff]   ;;  %v552_v8 = vld [vmem:[#allocation5 + $0x10] sm:$0xff]   ;;  %v189_v26 = vshrl.u32 %v188_v25, 7 }
  0x38   :  { %476 = vmatpush3.bf16.msra.mxu0 %v542_v1  ;;  %496 = vmatpush3.bf16.msra.mxu1 %v550_v4  ;;  %v547_v9 = vld [vmem:[#allocation3 + $0x28] sm:$0xff]   ;;  %v553_v10 = vld [vmem:[#allocation5 + $0x18] sm:$0xff]   ;;  %v548_v11 = vld [vmem:[#allocation3 + $0x30] sm:$0xff]  }
  0x39   :  { %477 = vmatprep.subr.bf16.mxu0 %v641_v0  ;;  %497 = vmatprep.subr.bf16.mxu1 %v641_v0  ;;  %v554_v12 = vld [vmem:[#allocation5 + $0x20] sm:$0xff]   ;;  %v549_v13 = vld [vmem:[#allocation3 + $0x38] sm:$0xff]   ;;  %v555_v15 = vld [vmem:[#allocation5 + $0x28] sm:$0xff]   ;;  %v190_v29 = vsub.s32 0, %v189_v26 }
  0x3a   :  { %v90_v14 = vld [vmem:[%s780_s0] sm:$0xff]  ;;  %v556_v17 = vld [vmem:[#allocation5 + $0x30] sm:$0xff]   ;;  %v557_v18 = vld [vmem:[#allocation5 + $0x38] sm:$0xff]  }
  0x3b   :  { %v91_v16 = vpack.c.bf16 %v90_v14, %v90_v14  ;;  %v558_v19 = vld [vmem:[#allocation7] sm:$0xff]   ;;  %v559_v20 = vld [vmem:[#allocation7 + $0x8] sm:$0xff]   ;;  %v560_v21 = vld [vmem:[#allocation7 + $0x10] sm:$0xff]  }
  0x3c   :  { %478 = vmatpush3.bf16.msra.mxu0 %v543_v2  ;;  %498 = vmatpush3.bf16.msra.mxu1 %v551_v6  ;;  %v561_v22 = vld [vmem:[#allocation7 + $0x18] sm:$0xff]   ;;  %v562_v23 = vld [vmem:[#allocation7 + $0x20] sm:$0xff]   ;;  %v563_v24 = vld [vmem:[#allocation7 + $0x28] sm:$0xff]  }
  0x3d   :  { %479 = vmatprep.subr.bf16.mxu0 %v641_v0  ;;  %499 = vmatprep.subr.bf16.mxu1 %v641_v0  ;;  %v186_v27 = vld [vmem:[%s782_s2] sm:$0x1]  ;;  %v564_v38 = vld [vmem:[#allocation7 + $0x30] sm:$0xff]   ;;  %v565_v39 = vld [vmem:[#allocation7 + $0x38] sm:$0xff]  }
  0x3e   :  { %v187_v28 = vunpack.c.l.bf16 %v186_v27  ;;  %v210_v40 = vld [vmem:[%s784_s4] sm:$0x1] }
  0x3f   :  { %v212_v41 = vunpack.c.l.bf16 %v210_v40  ;;  %v322_v50 = vld [vmem:[%s786_s6] sm:$0x1] }
  0x40   :  { %480 = vmatpush3.bf16.msra.mxu0 %v544_v3  ;;  %500 = vmatpush3.bf16.msra.mxu1 %v552_v8  ;;  %v191_v30 = vrot.slane %v187_v28, %v190_v29  ;;  %v324_v51 = vunpack.c.l.bf16 %v322_v50 }
  0x41   :  { %481 = vmatprep.subr.bf16.mxu0 %v641_v0  ;;  %501 = vmatprep.subr.bf16.mxu1 %v641_v0  ;;  %v216_v42 = vrot.slane %v212_v41, %v190_v29 }
  0x42   :  { %v328_v52 = vrot.slane %v324_v51, %v190_v29 }
  0x44   :  { %482 = vmatpush3.bf16.msra.mxu0 %v545_v5  ;;  %502 = vmatpush3.bf16.msra.mxu1 %v553_v10 }
  0x45   :  { %483 = vmatprep.subr.bf16.mxu0 %v641_v0  ;;  %503 = vmatprep.subr.bf16.mxu1 %v641_v0 }
  0x48   :  { %484 = vmatpush3.bf16.msra.mxu0 %v546_v7  ;;  %504 = vmatpush3.bf16.msra.mxu1 %v554_v12 }
  0x49   :  { %485 = vmatprep.subr.bf16.mxu0 %v641_v0  ;;  %505 = vmatprep.subr.bf16.mxu1 %v641_v0 }
  0x4c   :  { %486 = vmatpush3.bf16.msra.mxu0 %v547_v9  ;;  %506 = vmatpush3.bf16.msra.mxu1 %v555_v15 }
  0x4d   :  { %487 = vmatprep.subr.bf16.mxu0 %v641_v0  ;;  %507 = vmatprep.subr.bf16.mxu1 %v641_v0 }
  0x50   :  { %488 = vmatpush3.bf16.msra.mxu0 %v548_v11  ;;  %508 = vmatpush3.bf16.msra.mxu1 %v556_v17 }
  0x51   :  { %489 = vmatprep.subr.bf16.mxu0 %v641_v0  ;;  %509 = vmatprep.subr.bf16.mxu1 %v641_v0 }
  0x54   :  { %490 = vmatpush3.bf16.msra.mxu0 %v549_v13  ;;  %510 = vmatpush3.bf16.msra.mxu1 %v557_v18 }
  0x55   :  { %515 = vmatprep.subr.bf16.mxu0 %v641_v0 }
  0x57   :  { %492 = vmatmul.mubr.bf16.vlgmr.msra.gmra.mrb[0].mxu0 %v91_v16 }
  0x58   :  { %531 = vmatprep.mubr.msk.bf16.mxu0 %vm642_vm0, %v641_v0  ;;  %516 = vmatpush3.bf16.msra.mxu0 %v558_v19 }
  0x59   :  { %517 = vmatprep.subr.bf16.mxu0 %v641_v0 }
  0x5c   :  { %518 = vmatpush3.bf16.msra.mxu0 %v559_v20 }
  0x5d   :  { %519 = vmatprep.subr.bf16.mxu0 %v641_v0 }
  0x60   :  { %520 = vmatpush3.bf16.msra.mxu0 %v560_v21 }
  0x61   :  { %521 = vmatprep.subr.bf16.mxu0 %v641_v0 }
  0x64   :  { %522 = vmatpush3.bf16.msra.mxu0 %v561_v22 }
  0x65   :  { %523 = vmatprep.subr.bf16.mxu0 %v641_v0 }
  0x68   :  { %524 = vmatpush3.bf16.msra.mxu0 %v562_v23 }
  0x69   :  { %525 = vmatprep.subr.bf16.mxu0 %v641_v0 }
  0x6c   :  { %526 = vmatpush3.bf16.msra.mxu0 %v563_v24 }
  0x6d   :  { %527 = vmatprep.subr.bf16.mxu0 %v641_v0 }
  0x70   :  { %528 = vmatpush3.bf16.msra.mxu0 %v564_v38 }
  0x71   :  { %529 = vmatprep.subr.bf16.mxu0 %v641_v0 }
  0x74   :  { %530 = vmatpush3.bf16.msra.mxu0 %v565_v39 }
 0x12a   :  { %v174_v31 = vpop.f32.mrb[0].mxu0 }
 0x12b   :  { %v192_v32 = vadd.f32 %v191_v30, %v174_v31  ;;  %v493_v33 = vpop.f32.mrb[1].mxu0 }
 0x12c   :  { %v177_v34 = vpop.f32.mrb[2].mxu0 }
 0x12d   :  { %v193_v35 = vmax.f32 %v192_v32, 0.0  ;;  %v494_v36 = vpop.f32.mrb[3].mxu0 }
 0x12f   :  { %v211_v37 = vpack.c.bf16 %v193_v35, %v193_v35 }
 0x131   :  { %512 = vmatmul.mubr.bf16.vlgmr.msra.gmra.mrb[0].mxu1 %v211_v37 }
 0x204   :  { %v299_v43 = vpop.f32.mrb[0].mxu1 }
 0x205   :  { %v300_v44 = vadd.f32 %v299_v43, %v216_v42  ;;  %v513_v45 = vpop.f32.mrb[1].mxu1 }
 0x206   :  { %v302_v46 = vpop.f32.mrb[2].mxu1 }
 0x207   :  { %v305_v47 = vmax.f32 %v300_v44, 0.0  ;;  %v514_v48 = vpop.f32.mrb[3].mxu1 }
 0x209   :  { %v323_v49 = vpack.c.bf16 %v305_v47, %v305_v47 }
 0x20b   :  { %532 = vmatmul.mubr.bf16.vlgmr.msra.gmra.mrb[4].mxu0 %v323_v49 }
 0x2de   :  { %v411_v53 = vpop.f32.mrb[4].mxu0 }
 0x2df   :  { %v412_v54 = vadd.f32 %v411_v53, %v328_v52  ;;  %v533_v55 = vpop.f32.mrb[5].mxu0 }
 0x2e0   :  { %v414_v56 = vpop.f32.mrb[6].mxu0 }
 0x2e1   :  { %417 = vst [vmem:[%s787_s7] sm:$0xff] %v412_v54  ;;  %v534_v57 = vpop.f32.mrb[7].mxu0 }
 0x2e2   :  { %422 = vsyncpa [#allocation4], 1 }
 0x2e3   :  { %423 = vsyncpa [#allocation6], 1 }

</bundles_post_ra>
